<compile_context>
chip_gen: v5e
topology: v5e:2x2
jax: 0.10.0
libtpu: 0.0.40
codegen_flags: <defaults>
</compile_context>

<pallas_src>
import functools

import jax
import jax.numpy as jnp
from jax.experimental import pallas as pl
from jax.experimental.pallas import tpu as pltpu

EMBED_DIM = 32
MAX_BATCH_TILE = 512   # lane-dense batch tile cap (multiple of 128)


def _round_up(x, m):
    return pl.cdiv(x, m) * m


def _choose_batch_tile(batch):
    """Biggest useful lane-dense tile, but keep >= 2 grid steps when the batch
    allows it so both v7x TensorCores get work (free on v5e/v6e)."""
    b128 = _round_up(batch, 128)
    if b128 <= 128:
        return 128
    return min(MAX_BATCH_TILE, _round_up(pl.cdiv(b128, 2), 128))


def _rec_kernel(users_ref, autos_ref, scores_ref, out_ref, *, vu_pad):
    # users_ref / autos_ref : (1, TB)  int32  VMEM lane-dense index rows
    # scores_ref            : (VT, 1)  f32    whole-array VMEM-resident column
    #                         rows [0, vu_pad)  = user_table @ W_u^T + b
    #                         rows [vu_pad, VT) = auto_table @ W_a^T
    # out_ref               : (1, TB)  f32    lane-dense output row
    vt = scores_ref.shape[0]
    tb = out_ref.shape[1]

    row = jax.lax.broadcasted_iota(jnp.int32, (vt, tb), 0)            # sublane iota
    hit = (row == users_ref[...]) | (row == autos_ref[...] + vu_pad)  # VPU compares
    vals = jnp.where(hit, scores_ref[...], 0.0)                       # (VT, TB) f32, exact
    out_ref[...] = jnp.sum(vals, axis=0, keepdims=True)               # XLU sublane reduce


def fold_rec_params(user_table, auto_table, w, b):
    """Fold Linear(64->1) weights + bias into per-row scores.
    Call once per parameter update; the per-call forward is O(B) only."""
    n_users = user_table.shape[0]
    n_autos = auto_table.shape[0]
    vu_pad = _round_up(n_users, 128)
    va_pad = _round_up(n_autos, 128)

    w32 = w.astype(jnp.float32).reshape(-1)
    b32 = b.astype(jnp.float32).reshape(())
    hp = jax.lax.Precision.HIGHEST  # exact f32 fold -> matches jnp.take gather
    u_score = jnp.dot(user_table.astype(jnp.float32), w32[:EMBED_DIM], precision=hp) + b32
    a_score = jnp.dot(auto_table.astype(jnp.float32), w32[EMBED_DIM:], precision=hp)

    scores_col = jnp.concatenate([
        jnp.pad(u_score, (0, vu_pad - n_users)),
        jnp.pad(a_score, (0, va_pad - n_autos)),
    ]).reshape(vu_pad + va_pad, 1)
    meta = dict(n_users=n_users, n_autos=n_autos, vu_pad=vu_pad)
    return scores_col, meta


@functools.partial(jax.jit, static_argnames=("n_users", "n_autos", "vu_pad"))
def rec_forward(users, autos, scores_col, *, n_users, n_autos, vu_pad):
    """RecModel.forward: (B,) user/auto indices -> (B, 1) float32 scores."""
    batch = users.shape[0]
    tile = _choose_batch_tile(batch)
    b_pad = _round_up(batch, tile)

    users = jnp.clip(users.astype(jnp.int32), 0, n_users - 1)
    autos = jnp.clip(autos.astype(jnp.int32), 0, n_autos - 1)
    users_row = jnp.pad(users, (0, b_pad - batch)).reshape(1, b_pad)
    autos_row = jnp.pad(autos, (0, b_pad - batch)).reshape(1, b_pad)

    out_row = pl.pallas_call(
        functools.partial(_rec_kernel, vu_pad=vu_pad),
        out_shape=jax.ShapeDtypeStruct((1, b_pad), jnp.float32),
        grid=(b_pad // tile,),
        in_specs=[
            pl.BlockSpec((1, tile), lambda i: (0, i)),           # users (lane-dense)
            pl.BlockSpec((1, tile), lambda i: (0, i)),           # autos (lane-dense)
            # whole folded-score column: VMEM-resident, single-buffered
            pl.BlockSpec(memory_space=pltpu.MemorySpace.VMEM),
        ],
        out_specs=pl.BlockSpec((1, tile), lambda i: (0, i)),     # lane-dense output row
        compiler_params=pltpu.CompilerParams(
            dimension_semantics=("parallel",),
            vmem_limit_bytes=32 * 1024 * 1024),
    )(users_row, autos_row, scores_col)

    # Drop padded lanes, restore the module's (B, 1) output shape.
    return out_row[0, :batch].reshape(batch, 1)


def reference_forward(users, autos, user_table, auto_table, w, b):
    u = jnp.take(user_table, users, axis=0)
    a = jnp.take(auto_table, autos, axis=0)
    x = jnp.concatenate([u, a], axis=1)
    return jnp.dot(x, w.T, precision=jax.lax.Precision.HIGHEST) + b


if __name__ == "__main__":
    n_users, n_autos, batch = 16, 12, 8

    key = jax.random.PRNGKey(0)
    k_ut, k_at, k_w, k_b, k_u, k_a = jax.random.split(key, 6)

    # Deterministic synthetic params (nn.Embedding ~ N(0,1),
    # nn.Linear ~ U(-1/sqrt(64), 1/sqrt(64))).
    user_table = jax.random.normal(k_ut, (n_users, EMBED_DIM), dtype=jnp.float32)
    auto_table = jax.random.normal(k_at, (n_autos, EMBED_DIM), dtype=jnp.float32)
    bound = 1.0 / jnp.sqrt(2.0 * EMBED_DIM)
    w = jax.random.uniform(k_w, (1, 2 * EMBED_DIM), jnp.float32, -bound, bound)
    b = jax.random.uniform(k_b, (1,), jnp.float32, -bound, bound)

    users = jax.random.randint(k_u, (batch,), 0, n_users, dtype=jnp.int32)
    autos = jax.random.randint(k_a, (batch,), 0, n_autos, dtype=jnp.int32)

    # Fold once per parameter update (hoisted out of the per-forward path).
    scores_col, meta = fold_rec_params(user_table, auto_table, w, b)

    out = rec_forward(users, autos, scores_col, **meta)
    out = jax.block_until_ready(out)

    ref = reference_forward(users, autos, user_table, auto_table, w, b)
    assert out.shape == (batch, 1)
    assert jnp.allclose(out, ref, atol=1e-5, rtol=1e-5), float(jnp.max(jnp.abs(out - ref)))

    print("KERNEL_OK")
</pallas_src>

<mosaic_0001>
module attributes {stable_mosaic.version = 11 : i64} {
  func.func @_rec_kernel(%arg0: i32, %arg1: memref<1x128xi32, #tpu.memory_space<vmem>>, %arg2: memref<1x128xi32, #tpu.memory_space<vmem>>, %arg3: memref<256x1xf32, #tpu.memory_space<vmem>>, %arg4: memref<1x128xf32, #tpu.memory_space<vmem>>) attributes {dimension_semantics = [#tpu.dimension_semantics<parallel>], iteration_bounds = array<i64: 1>, scalar_prefetch = 0 : i64, scratch_operands = 0 : i64, tpu.core_type = #tpu.core_type<tc>, window_params = [{transform_indices = @transform_0, window_bounds = array<i64: 1, 128>}, {transform_indices = @transform_1, window_bounds = array<i64: 1, 128>}, {pipeline_mode = #tpu.pipeline_mode<synchronous>, transform_indices = @transform_2, window_bounds = array<i64: 256, 1>}, {transform_indices = @transform_3, window_bounds = array<i64: 1, 128>}]} {
    %0 = tpu.iota {dimensions = array<i32: 0>} : vector<256x128xi32>
    %c0 = arith.constant 0 : index
    %c0_0 = arith.constant 0 : index
    %1 = vector.load %arg1[%c0, %c0_0] : memref<1x128xi32, #tpu.memory_space<vmem>>, vector<1x128xi32>
    %2 = vector.broadcast %1 : vector<1x128xi32> to vector<256x128xi32>
    %3 = arith.cmpi eq, %0, %2 : vector<256x128xi32>
    %c0_1 = arith.constant 0 : index
    %c0_2 = arith.constant 0 : index
    %4 = vector.load %arg2[%c0_1, %c0_2] : memref<1x128xi32, #tpu.memory_space<vmem>>, vector<1x128xi32>
    %c128_i32 = arith.constant 128 : i32
    %5 = vector.broadcast %c128_i32 : i32 to vector<1x128xi32>
    %6 = arith.addi %4, %5 : vector<1x128xi32>
    %7 = vector.broadcast %6 : vector<1x128xi32> to vector<256x128xi32>
    %8 = arith.cmpi eq, %0, %7 : vector<256x128xi32>
    %9 = arith.ori %3, %8 : vector<256x128xi1>
    %c0_3 = arith.constant 0 : index
    %c0_4 = arith.constant 0 : index
    %10 = vector.load %arg3[%c0_3, %c0_4] : memref<256x1xf32, #tpu.memory_space<vmem>>, vector<256x1xf32>
    %cst = arith.constant 0.000000e+00 : f32
    %11 = vector.shape_cast %10 : vector<256x1xf32> to vector<256x1xf32>
    %12 = vector.broadcast %11 : vector<256x1xf32> to vector<256x128xf32>
    %13 = vector.broadcast %cst : f32 to vector<256x128xf32>
    %14 = arith.select %9, %12, %13 : vector<256x128xi1>, vector<256x128xf32>
    %cst_5 = arith.constant dense<0.000000e+00> : vector<128xf32>
    %15 = vector.multi_reduction <add>, %14, %cst_5 [0] : vector<256x128xf32> to vector<128xf32>
    %16 = vector.shape_cast %15 : vector<128xf32> to vector<1x128xf32>
    %c0_6 = arith.constant 0 : index
    %c0_7 = arith.constant 0 : index
    %17 = vector.load %arg4[%c0_6, %c0_7] : memref<1x128xf32, #tpu.memory_space<vmem>>, vector<1x128xf32>
    tpu.vector_store %arg4[%c0_6, %c0_7], %16 {strides = array<i32>} : memref<1x128xf32, #tpu.memory_space<vmem>>, vector<1x128xf32>,
    return
  }
  func.func @transform_0(%arg0: i32) -> (i32, i32) {
    %c0_i32 = arith.constant 0 : i32
    %c0_i32_0 = arith.constant 0 : i32
    return %c0_i32, %arg0 : i32, i32
  }
  func.func @transform_1(%arg0: i32) -> (i32, i32) {
    %c0_i32 = arith.constant 0 : i32
    %c0_i32_0 = arith.constant 0 : i32
    return %c0_i32, %arg0 : i32, i32
  }
  func.func @transform_2(%arg0: i32) -> (i32, i32) {
    %c0_i32 = arith.constant 0 : i32
    %c0_i32_0 = arith.constant 0 : i32
    %c0_i32_1 = arith.constant 0 : i32
    return %c0_i32, %c0_i32_0 : i32, i32
  }
  func.func @transform_3(%arg0: i32) -> (i32, i32) {
    %c0_i32 = arith.constant 0 : i32
    %c0_i32_0 = arith.constant 0 : i32
    return %c0_i32, %arg0 : i32, i32
  }
}

</mosaic_0001>

<bundles_post_ra>
// kernel: rec_forward.1
= control target key start
LH: loop header
LB: loop body
LE: loop exit
PB: predicated region body
PF: predicated region fallthrough
CT: control target
= control target key end

     0   :  { %v419_v0 = vmov 0   ;;  %v14_v35 = vlaneseq  ;;  %s660_s2 = inlined_call_operand.vmem [shape: f32[256,1], index: 2, kind: input, shape index: {}]   ;;  %s661_s0 = inlined_call_operand.vmem [shape: s32[1,128], index: 0, kind: input, shape index: {}]   ;;  %s662_s1 = inlined_call_operand.vmem [shape: s32[1,128], index: 1, kind: input, shape index: {}]   ;;  %s663_s3 = inlined_call_operand.vmem [shape: f32[1,128], index: 3, kind: output, shape index: {}]  }
   0x1   :  { %417 = vset.pattern.permute.xlu2 %v419_v0  ;;  %416 = vset.pattern.permute.xlu1 %v419_v0  ;;  %v152_v1 = vld [vmem:[%s660_s2 + $0x20] sm:$0xff]  ;;  %v150_v2 = vld [vmem:[%s660_s2 + $0x10] sm:$0xff]  ;;  %v153_v4 = vld [vmem:[%s660_s2 + $0x28] sm:$0xff] }
   0x2   :  { %v148_v3 = vld [vmem:[%s660_s2] sm:$0xff]  ;;  %415 = vset.pattern.permute.xlu0 %v419_v0  ;;  %202 = vperm.xlu2 %417, %v152_v1   ;;  %v151_v5 = vld [vmem:[%s660_s2 + $0x18] sm:$0xff]  ;;  %v149_v6 = vld [vmem:[%s660_s2 + $0x8] sm:$0xff]  ;;  %v539_v38 = vshrl.u32 %v14_v35, 7 }
   0x3   :  { %192 = vperm.xlu1 %416, %v150_v2   ;;  %182 = vperm.xlu0 %415, %v148_v3   ;;  %v156_v7 = vld [vmem:[%s660_s2 + $0x40] sm:$0xff]  ;;  %v155_v8 = vld [vmem:[%s660_s2 + $0x38] sm:$0xff]  ;;  %v154_v9 = vld [vmem:[%s660_s2 + $0x30] sm:$0xff] }
   0x4   :  { %v159_v10 = vld [vmem:[%s660_s2 + $0x58] sm:$0xff]  ;;  %v158_v11 = vld [vmem:[%s660_s2 + $0x50] sm:$0xff]  ;;  %v157_v12 = vld [vmem:[%s660_s2 + $0x48] sm:$0xff]  ;;  %v16_v41 = vadd.s32 8, %v539_v38  ;;  %v17_v44 = vadd.s32 16, %v539_v38  ;;  %v18_v45 = vadd.s32 24, %v539_v38 }
   0x5   :  { %v162_v13 = vld [vmem:[%s660_s2 + $0x70] sm:$0xff]  ;;  %v161_v14 = vld [vmem:[%s660_s2 + $0x68] sm:$0xff]  ;;  %v160_v15 = vld [vmem:[%s660_s2 + $0x60] sm:$0xff]  ;;  %v19_v46 = vadd.s32 32, %v539_v38  ;;  %v20_v48 = vadd.s32 40, %v539_v38  ;;  %v21_v53 = vadd.s32 48, %v539_v38 }
   0x6   :  { %v165_v16 = vld [vmem:[%s660_s2 + $0x88] sm:$0xff]  ;;  %v164_v17 = vld [vmem:[%s660_s2 + $0x80] sm:$0xff]  ;;  %v163_v18 = vld [vmem:[%s660_s2 + $0x78] sm:$0xff]  ;;  %v22_v56 = vadd.s32 56, %v539_v38  ;;  %v23_v59 = vadd.s32 64, %v539_v38  ;;  %v24_v1 = vadd.s32 72, %v539_v38 }
   0x7   :  { %v168_v19 = vld [vmem:[%s660_s2 + $0xa0] sm:$0xff]  ;;  %v167_v20 = vld [vmem:[%s660_s2 + $0x98] sm:$0xff]  ;;  %v166_v21 = vld [vmem:[%s660_s2 + $0x90] sm:$0xff] }
   0x8   :  { %v171_v22 = vld [vmem:[%s660_s2 + $0xb8] sm:$0xff]  ;;  %v170_v23 = vld [vmem:[%s660_s2 + $0xb0] sm:$0xff]  ;;  %v169_v24 = vld [vmem:[%s660_s2 + $0xa8] sm:$0xff] }
   0x9   :  { %v174_v25 = vld [vmem:[%s660_s2 + $0xd0] sm:$0xff]  ;;  %v173_v26 = vld [vmem:[%s660_s2 + $0xc8] sm:$0xff]  ;;  %v172_v27 = vld [vmem:[%s660_s2 + $0xc0] sm:$0xff] }
   0xa   :  { %207 = vperm.xlu2 %417, %v153_v4   ;;  %v177_v28 = vld [vmem:[%s660_s2 + $0xe8] sm:$0xff]  ;;  %v176_v29 = vld [vmem:[%s660_s2 + $0xe0] sm:$0xff]  ;;  %v175_v30 = vld [vmem:[%s660_s2 + $0xd8] sm:$0xff] }
   0xb   :  { %197 = vperm.xlu1 %416, %v151_v5   ;;  %187 = vperm.xlu0 %415, %v149_v6   ;;  %v179_v31 = vld [vmem:[%s660_s2 + $0xf8] sm:$0xff]  ;;  %v178_v32 = vld [vmem:[%s660_s2 + $0xf0] sm:$0xff]  ;;  %v81_v34 = vld [vmem:[%s662_s1] sm:$0x1]  ;;  %v25_v6 = vadd.s32 80, %v539_v38 }
   0xc   :  { %v82_v36 = vadd.s32 128, %v81_v34  ;;  %v544_v39 = vld [vmem:[%s661_s0] ss:$0 sm:$0xff] }
   0xd   :  { %vm49_vm0 = vcmp.eq.s32.totalorder %v539_v38, %v544_v39  ;;  %vm50_vm2 = vcmp.eq.s32.totalorder %v16_v41, %v544_v39  ;;  %vm51_vm4 = vcmp.eq.s32.totalorder %v17_v44, %v544_v39  ;;  %vm52_vm8 = vcmp.eq.s32.totalorder %v18_v45, %v544_v39 }
   0xe   :  { %v546_v40 = vperm.slane %v82_v36, 0  ;;  %vm53_vm10 = vcmp.eq.s32.totalorder %v19_v46, %v544_v39  ;;  %vm54_vm14 = vcmp.eq.s32.totalorder %v20_v48, %v544_v39  ;;  %v32_v36 = vadd.s32 136, %v539_v38 }
  0x10   :  { %vm84_vm1 = vcmp.eq.s32.totalorder %v539_v38, %v546_v40  ;;  %vm85_vm3 = vcmp.eq.s32.totalorder %v16_v41, %v546_v40  ;;  %vm86_vm5 = vcmp.eq.s32.totalorder %v17_v44, %v546_v40  ;;  %vm87_vm9 = vcmp.eq.s32.totalorder %v18_v45, %v546_v40 }
  0x11   :  { %vm116_vm6 = vmor %vm49_vm0, %vm84_vm1  ;;  %vm88_vm12 = vcmp.eq.s32.totalorder %v19_v46, %v546_v40  ;;  %vm89_vm15 = vcmp.eq.s32.totalorder %v20_v48, %v546_v40  ;;  %vm55_vm1 = vcmp.eq.s32.totalorder %v21_v53, %v544_v39  ;;  %v33_v41 = vadd.s32 144, %v539_v38 }
  0x12   :  { %222 = vperm.xlu2 %417, %v156_v7   ;;  %vm117_vm7 = vmor %vm50_vm2, %vm85_vm3  ;;  %vm90_vm2 = vcmp.eq.s32.totalorder %v21_v53, %v546_v40  ;;  %v34_v46 = vadd.s32 152, %v539_v38  ;;  %v36_v53 = vadd.s32 168, %v539_v38 }
  0x13   :  { %217 = vperm.xlu1 %416, %v155_v8   ;;  %212 = vperm.xlu0 %415, %v154_v9   ;;  %vm118_vm11 = vmor %vm51_vm4, %vm86_vm5  ;;  %vm56_vm4 = vcmp.eq.s32.totalorder %v22_v56, %v544_v39  ;;  %vm91_vm5 = vcmp.eq.s32.totalorder %v22_v56, %v546_v40 }
  0x14   :  { %vm119_vm13 = vmor %vm52_vm8, %vm87_vm9  ;;  %vm92_vm8 = vcmp.eq.s32.totalorder %v23_v59, %v546_v40 }
  0x15   :  { %vm569_vm0 = vmor %vm53_vm10, %vm88_vm12  ;;  %vm58_vm10 = vcmp.eq.s32.totalorder %v24_v1, %v544_v39 }
  0x16   :  { %vm576_vm3 = vmor %vm54_vm14, %vm89_vm15  ;;  %vm94_vm14 = vcmp.eq.s32.totalorder %v25_v6, %v546_v40 }
  0x17   :  { %vm123_vm9 = vmor %vm56_vm4, %vm91_vm5 }
  0x1a   :  { %237 = vperm.xlu2 %417, %v159_v10   ;;  %v26_v10 = vadd.s32 88, %v539_v38 }
  0x1b   :  { %232 = vperm.xlu1 %416, %v158_v11   ;;  %227 = vperm.xlu0 %415, %v157_v12  }
  0x22   :  { %252 = vperm.xlu2 %417, %v162_v13  }
  0x23   :  { %247 = vperm.xlu1 %416, %v161_v14   ;;  %242 = vperm.xlu0 %415, %v160_v15   ;;  %v27_v14 = vadd.s32 96, %v539_v38 }
  0x25   :  { %vm96_vm4 = vcmp.eq.s32.totalorder %v27_v14, %v546_v40 }
  0x2a   :  { %267 = vperm.xlu2 %417, %v165_v16  }
  0x2b   :  { %262 = vperm.xlu1 %416, %v164_v17   ;;  %257 = vperm.xlu0 %415, %v163_v18  }
  0x32   :  { %282 = vperm.xlu2 %417, %v168_v19  }
  0x33   :  { %277 = vperm.xlu1 %416, %v167_v20   ;;  %272 = vperm.xlu0 %415, %v166_v21   ;;  %v28_v20 = vadd.s32 104, %v539_v38 }
  0x3a   :  { %297 = vperm.xlu2 %417, %v171_v22  }
  0x3b   :  { %292 = vperm.xlu1 %416, %v170_v23   ;;  %287 = vperm.xlu0 %415, %v169_v24   ;;  %v29_v24 = vadd.s32 112, %v539_v38 }
  0x42   :  { %312 = vperm.xlu2 %417, %v174_v25  }
  0x43   :  { %307 = vperm.xlu1 %416, %v173_v26   ;;  %302 = vperm.xlu0 %415, %v172_v27   ;;  %v30_v26 = vadd.s32 120, %v539_v38 }
  0x4a   :  { %327 = vperm.xlu2 %417, %v177_v28  }
  0x4b   :  { %322 = vperm.xlu1 %416, %v176_v29   ;;  %317 = vperm.xlu0 %415, %v175_v30  }
  0x53   :  { %337 = vperm.xlu1 %416, %v179_v31   ;;  %332 = vperm.xlu0 %415, %v178_v32   ;;  %v31_v31 = vadd.s32 128, %v539_v38 }
  0x5c   :  { %v203_v33 = vpop.permute.xlu2 %202 }
  0x5d   :  { %v344_v63 = vsel %vm569_vm0, %v203_v33, 0.0 }
  0x64   :  { %v208_v37 = vpop.permute.xlu2 %207 }
  0x65   :  { %v345_v5 = vsel %vm576_vm3, %v208_v37, 0.0  ;;  %vm61_vm3 = vcmp.eq.s32.totalorder %v27_v14, %v544_v39 }
  0x6c   :  { %v223_v47 = vpop.permute.xlu2 %222 }
  0x74   :  { %v238_v0 = vpop.permute.xlu2 %237 }
  0x75   :  { %v193_v42 = vpop.permute.xlu1 %192  ;;  %v183_v43 = vpop.permute.xlu0 %182 }
  0x76   :  { %v340_v51 = vsel %vm116_vm6, %v183_v43, 0.0  ;;  %v342_v55 = vsel %vm118_vm11, %v193_v42, 0.0  ;;  %vm122_vm6 = vmor %vm55_vm1, %vm90_vm2  ;;  %vm93_vm11 = vcmp.eq.s32.totalorder %v24_v1, %v546_v40  ;;  %vm60_vm1 = vcmp.eq.s32.totalorder %v26_v10, %v544_v39 }
  0x77   :  { %vm125_vm15 = vmor %vm58_vm10, %vm93_vm11  ;;  %vm95_vm2 = vcmp.eq.s32.totalorder %v26_v10, %v546_v40  ;;  %vm63_vm10 = vcmp.eq.s32.totalorder %v29_v24, %v544_v39  ;;  %vm98_vm11 = vcmp.eq.s32.totalorder %v29_v24, %v546_v40  ;;  %v39_v1 = vadd.s32 192, %v539_v38 }
  0x78   :  { %vm127_vm5 = vmor %vm60_vm1, %vm95_vm2  ;;  %v41_v10 = vadd.s32 208, %v539_v38  ;;  %v45_v24 = vadd.s32 240, %v539_v38 }
  0x79   :  { %v351_v25 = vsel %vm127_vm5, %v238_v0, 0.0  ;;  %vm67_vm5 = vcmp.eq.s32.totalorder %v33_v41, %v544_v39 }
  0x7c   :  { %v253_v18 = vpop.permute.xlu2 %252 }
  0x7d   :  { %v198_v49 = vpop.permute.xlu1 %197  ;;  %v188_v50 = vpop.permute.xlu0 %187 }
  0x7e   :  { %v341_v52 = vsel %vm117_vm7, %v188_v50, 0.0  ;;  %v343_v60 = vsel %vm119_vm13, %v198_v49, 0.0  ;;  %vm57_vm7 = vcmp.eq.s32.totalorder %v23_v59, %v544_v39  ;;  %vm59_vm13 = vcmp.eq.s32.totalorder %v25_v6, %v544_v39 }
  0x7f   :  { %v372_v54 = vadd.f32 %v341_v52, %v340_v51  ;;  %vm124_vm12 = vmor %vm57_vm7, %vm92_vm8  ;;  %vm97_vm7 = vcmp.eq.s32.totalorder %v28_v20, %v546_v40  ;;  %v35_v50 = vadd.s32 160, %v539_v38  ;;  %v40_v6 = vadd.s32 200, %v539_v38 }
  0x80   :  { %v348_v13 = vsel %vm124_vm12, %v223_v47, 0.0  ;;  %vm126_vm0 = vmor %vm59_vm13, %vm94_vm14  ;;  %vm64_vm12 = vcmp.eq.s32.totalorder %v30_v26, %v544_v39  ;;  %vm99_vm13 = vcmp.eq.s32.totalorder %v30_v26, %v546_v40 }
  0x81   :  { %v373_v58 = vadd.f32 %v372_v54, %v342_v55  ;;  %vm128_vm8 = vmor %vm61_vm3, %vm96_vm4  ;;  %vm66_vm3 = vcmp.eq.s32.totalorder %v32_v36, %v544_v39  ;;  %vm101_vm4 = vcmp.eq.s32.totalorder %v32_v36, %v546_v40 }
  0x82   :  { %vm130_vm14 = vmor %vm63_vm10, %vm98_vm11 }
  0x83   :  { %v374_v62 = vadd.f32 %v373_v58, %v343_v60  ;;  %vm131_vm1 = vmor %vm64_vm12, %vm99_vm13  ;;  %v354_v37 = vsel %vm130_vm14, %v253_v18, 0.0  ;;  %vm69_vm12 = vcmp.eq.s32.totalorder %v35_v50, %v544_v39  ;;  %vm104_vm13 = vcmp.eq.s32.totalorder %v35_v50, %v546_v40 }
  0x84   :  { %v268_v33 = vpop.permute.xlu2 %267  ;;  %v37_v58 = vadd.s32 176, %v539_v38  ;;  %vm70_vm14 = vcmp.eq.s32.totalorder %v36_v53, %v544_v39 }
  0x85   :  { %v218_v2 = vpop.permute.xlu1 %217  ;;  %v213_v3 = vpop.permute.xlu0 %212  ;;  %v375_v4 = vadd.f32 %v374_v62, %v344_v63  ;;  %v38_v62 = vadd.s32 184, %v539_v38 }
  0x86   :  { %v346_v8 = vsel %vm122_vm6, %v213_v3, 0.0  ;;  %v347_v11 = vsel %vm123_vm9, %v218_v2, 0.0  ;;  %vm62_vm6 = vcmp.eq.s32.totalorder %v28_v20, %v544_v39 }
  0x87   :  { %v376_v7 = vadd.f32 %v375_v4, %v345_v5  ;;  %vm129_vm9 = vmor %vm62_vm6, %vm97_vm7  ;;  %vm102_vm6 = vcmp.eq.s32.totalorder %v33_v41, %v546_v40 }
  0x88   :  { %vm133_vm7 = vmor %vm66_vm3, %vm101_vm4 }
  0x89   :  { %v377_v9 = vadd.f32 %v376_v7, %v346_v8  ;;  %vm134_vm10 = vmor %vm67_vm5, %vm102_vm6  ;;  %v357_v52 = vsel %vm133_vm7, %v268_v33, 0.0  ;;  %vm72_vm5 = vcmp.eq.s32.totalorder %v38_v62, %v544_v39  ;;  %vm107_vm6 = vcmp.eq.s32.totalorder %v38_v62, %v546_v40 }
  0x8a   :  { %vm73_vm7 = vcmp.eq.s32.totalorder %v39_v1, %v544_v39 }
  0x8b   :  { %v378_v12 = vadd.f32 %v377_v9, %v347_v11 }
  0x8c   :  { %v283_v51 = vpop.permute.xlu2 %282 }
  0x8d   :  { %v233_v15 = vpop.permute.xlu1 %232  ;;  %v228_v16 = vpop.permute.xlu0 %227  ;;  %v379_v17 = vadd.f32 %v378_v12, %v348_v13  ;;  %v42_v12 = vadd.s32 216, %v539_v38 }
  0x8e   :  { %v349_v19 = vsel %vm125_vm15, %v228_v16, 0.0  ;;  %v350_v22 = vsel %vm126_vm0, %v233_v15, 0.0  ;;  %vm65_vm15 = vcmp.eq.s32.totalorder %v31_v31, %v544_v39  ;;  %vm100_vm0 = vcmp.eq.s32.totalorder %v31_v31, %v546_v40 }
  0x8f   :  { %v380_v21 = vadd.f32 %v379_v17, %v349_v19  ;;  %vm132_vm2 = vmor %vm65_vm15, %vm100_vm0  ;;  %vm105_vm15 = vcmp.eq.s32.totalorder %v36_v53, %v546_v40  ;;  %v43_v17 = vadd.s32 224, %v539_v38 }
  0x90   :  { %vm136_vm0 = vmor %vm69_vm12, %vm104_vm13 }
  0x91   :  { %v381_v23 = vadd.f32 %v380_v21, %v350_v22  ;;  %vm137_vm3 = vmor %vm70_vm14, %vm105_vm15  ;;  %v360_v63 = vsel %vm136_vm0, %v283_v51, 0.0  ;;  %vm75_vm14 = vcmp.eq.s32.totalorder %v41_v10, %v544_v39  ;;  %vm110_vm15 = vcmp.eq.s32.totalorder %v41_v10, %v546_v40 }
  0x92   :  { %vm76_vm0 = vcmp.eq.s32.totalorder %v42_v12, %v544_v39  ;;  %v44_v22 = vadd.s32 232, %v539_v38 }
  0x93   :  { %v382_v29 = vadd.f32 %v381_v23, %v351_v25 }
  0x94   :  { %v298_v0 = vpop.permute.xlu2 %297 }
  0x95   :  { %v248_v27 = vpop.permute.xlu1 %247  ;;  %v243_v28 = vpop.permute.xlu0 %242 }
  0x96   :  { %v352_v30 = vsel %vm128_vm8, %v243_v28, 0.0  ;;  %v353_v34 = vsel %vm129_vm9, %v248_v27, 0.0  ;;  %vm68_vm8 = vcmp.eq.s32.totalorder %v34_v46, %v544_v39  ;;  %vm103_vm9 = vcmp.eq.s32.totalorder %v34_v46, %v546_v40 }
  0x97   :  { %v383_v32 = vadd.f32 %v382_v29, %v352_v30  ;;  %vm135_vm11 = vmor %vm68_vm8, %vm103_vm9  ;;  %vm108_vm8 = vcmp.eq.s32.totalorder %v39_v1, %v546_v40  ;;  %v46_v29 = vadd.s32 248, %v539_v38 }
  0x98   :  { %vm139_vm9 = vmor %vm72_vm5, %vm107_vm6 }
  0x99   :  { %v384_v35 = vadd.f32 %v383_v32, %v353_v34  ;;  %vm140_vm12 = vmor %vm73_vm7, %vm108_vm8  ;;  %v363_v11 = vsel %vm139_vm9, %v298_v0, 0.0  ;;  %vm78_vm7 = vcmp.eq.s32.totalorder %v44_v22, %v544_v39  ;;  %vm113_vm8 = vcmp.eq.s32.totalorder %v44_v22, %v546_v40 }
  0x9a   :  { %vm79_vm9 = vcmp.eq.s32.totalorder %v45_v24, %v544_v39 }
  0x9b   :  { %v385_v44 = vadd.f32 %v384_v35, %v354_v37 }
  0x9c   :  { %v313_v18 = vpop.permute.xlu2 %312 }
  0x9d   :  { %v263_v42 = vpop.permute.xlu1 %262  ;;  %v258_v43 = vpop.permute.xlu0 %257 }
  0x9e   :  { %v355_v45 = vsel %vm131_vm1, %v258_v43, 0.0  ;;  %v356_v48 = vsel %vm132_vm2, %v263_v42, 0.0  ;;  %vm71_vm1 = vcmp.eq.s32.totalorder %v37_v58, %v544_v39  ;;  %vm106_vm2 = vcmp.eq.s32.totalorder %v37_v58, %v546_v40 }
  0x9f   :  { %v386_v47 = vadd.f32 %v385_v44, %v355_v45  ;;  %vm138_vm4 = vmor %vm71_vm1, %vm106_vm2  ;;  %vm111_vm1 = vcmp.eq.s32.totalorder %v42_v12, %v546_v40 }
  0xa0   :  { %vm142_vm2 = vmor %vm75_vm14, %vm110_vm15 }
  0xa1   :  { %v387_v49 = vadd.f32 %v386_v47, %v356_v48  ;;  %vm143_vm5 = vmor %vm76_vm0, %vm111_vm1  ;;  %v366_v23 = vsel %vm142_vm2, %v313_v18, 0.0 }
  0xa3   :  { %v388_v56 = vadd.f32 %v387_v49, %v357_v52 }
  0xa4   :  { %v328_v32 = vpop.permute.xlu2 %327 }
  0xa5   :  { %v278_v54 = vpop.permute.xlu1 %277  ;;  %v273_v55 = vpop.permute.xlu0 %272 }
  0xa6   :  { %v358_v57 = vsel %vm134_vm10, %v273_v55, 0.0  ;;  %v359_v60 = vsel %vm135_vm11, %v278_v54, 0.0  ;;  %vm74_vm10 = vcmp.eq.s32.totalorder %v40_v6, %v544_v39  ;;  %vm109_vm11 = vcmp.eq.s32.totalorder %v40_v6, %v546_v40 }
  0xa7   :  { %v389_v59 = vadd.f32 %v388_v56, %v358_v57  ;;  %vm141_vm13 = vmor %vm74_vm10, %vm109_vm11  ;;  %vm114_vm10 = vcmp.eq.s32.totalorder %v45_v24, %v546_v40 }
  0xa8   :  { %vm145_vm11 = vmor %vm78_vm7, %vm113_vm8 }
  0xa9   :  { %v390_v61 = vadd.f32 %v389_v59, %v359_v60  ;;  %vm146_vm14 = vmor %vm79_vm9, %vm114_vm10  ;;  %v369_v34 = vsel %vm145_vm11, %v328_v32, 0.0 }
  0xab   :  { %v391_v4 = vadd.f32 %v390_v61, %v360_v63 }
  0xad   :  { %v293_v2 = vpop.permute.xlu1 %292  ;;  %v288_v3 = vpop.permute.xlu0 %287 }
  0xae   :  { %v361_v5 = vsel %vm137_vm3, %v288_v3, 0.0  ;;  %v362_v8 = vsel %vm138_vm4, %v293_v2, 0.0  ;;  %vm77_vm3 = vcmp.eq.s32.totalorder %v43_v17, %v544_v39  ;;  %vm112_vm4 = vcmp.eq.s32.totalorder %v43_v17, %v546_v40 }
  0xaf   :  { %v392_v7 = vadd.f32 %v391_v4, %v361_v5  ;;  %vm144_vm6 = vmor %vm77_vm3, %vm112_vm4 }
  0xb1   :  { %v393_v9 = vadd.f32 %v392_v7, %v362_v8 }
  0xb3   :  { %v394_v15 = vadd.f32 %v393_v9, %v363_v11 }
  0xb5   :  { %v308_v13 = vpop.permute.xlu1 %307  ;;  %v303_v14 = vpop.permute.xlu0 %302 }
  0xb6   :  { %v364_v16 = vsel %vm140_vm12, %v303_v14, 0.0  ;;  %v365_v20 = vsel %vm141_vm13, %v308_v13, 0.0  ;;  %vm80_vm12 = vcmp.eq.s32.totalorder %v46_v29, %v544_v39  ;;  %vm115_vm13 = vcmp.eq.s32.totalorder %v46_v29, %v546_v40 }
  0xb7   :  { %v395_v19 = vadd.f32 %v394_v15, %v364_v16  ;;  %vm147_vm15 = vmor %vm80_vm12, %vm115_vm13 }
  0xb9   :  { %v396_v21 = vadd.f32 %v395_v19, %v365_v20 }
  0xbb   :  { %v397_v27 = vadd.f32 %v396_v21, %v366_v23 }
  0xbd   :  { %v323_v25 = vpop.permute.xlu1 %322  ;;  %v318_v26 = vpop.permute.xlu0 %317 }
  0xbe   :  { %v367_v28 = vsel %vm143_vm5, %v318_v26, 0.0  ;;  %v368_v31 = vsel %vm144_vm6, %v323_v25, 0.0 }
  0xbf   :  { %v398_v30 = vadd.f32 %v397_v27, %v367_v28 }
  0xc1   :  { %v399_v33 = vadd.f32 %v398_v30, %v368_v31 }
  0xc3   :  { %v400_v37 = vadd.f32 %v399_v33, %v369_v34 }
  0xc5   :  { %v338_v35 = vpop.permute.xlu1 %337  ;;  %v333_v36 = vpop.permute.xlu0 %332 }
  0xc6   :  { %v370_v38 = vsel %vm146_vm14, %v333_v36, 0.0  ;;  %v371_v42 = vsel %vm147_vm15, %v338_v35, 0.0 }
  0xc7   :  { %v401_v41 = vadd.f32 %v400_v37, %v370_v38 }
  0xc9   :  { %v402_v43 = vadd.f32 %v401_v41, %v371_v42 }
  0xcb   :  { %v403_v44 = vrot.slane %v402_v43, 4 }
  0xcd   :  { %v404_v45 = vadd.f32 %v403_v44, %v402_v43 }
  0xcf   :  { %v405_v46 = vrot.slane %v404_v45, 2 }
  0xd1   :  { %v406_v47 = vadd.f32 %v405_v46, %v404_v45 }
  0xd3   :  { %v407_v48 = vrot.slane %v406_v47, 1 }
  0xd5   :  { %v408_v49 = vadd.f32 %v407_v48, %v406_v47 }
  0xd7   :  { %409 = vst [vmem:[%s663_s3] sm:$0x1] %v408_v49 }

</bundles_post_ra>
